<compile_context>
chip_gen: v7x
topology: tpu7x:2x2x1
jax: 0.10.0
libtpu: 0.0.40
codegen_flags: <defaults>
</compile_context>

<pallas_src>
import functools
import math

import jax
import jax.numpy as jnp
from jax.experimental import pallas as pl
from jax.experimental.pallas import tpu as pltpu

# ---------------- model dims (small, synthetic) ----------------
B, S = 2, 8          # batch, sequence
D = 32               # hidden size
H = 4                # attention heads
DH = D // H          # head dim
FFN = 64             # intermediate size
VOCAB = 64
EPS = 1e-5


def _ln(x, g, b, eps):
    """LayerNorm over the last axis; x:[S,D], g/b:[1,D] (all f32, VPU/EUP math)."""
    mu = jnp.mean(x, axis=-1, keepdims=True)
    var = jnp.mean((x - mu) ** 2, axis=-1, keepdims=True)
    return (x - mu) * jax.lax.rsqrt(var + eps) * g + b


# ---------------- fused kernel: encoder layer + BGE-M3 sparse head ----------------
def _fused_encoder_sparse_kernel(
    tok_ref, pos_ref, mask_ref,
    ln_e_g, ln_e_b,
    w_qkv, b_qkv, wo, bo, ln1_g, ln1_b,
    w1, b1, w2, b2, ln2_g, ln2_b,
    w_sp, b_sp,
    o_ref, *, scale, eps):
    # ---- embedding sum + embedding LayerNorm ----
    x = tok_ref[0].astype(jnp.float32) + pos_ref[...]          # [S, D]
    x = _ln(x, ln_e_g[...], ln_e_b[...], eps)

    # ---- fused QKV projection: one MXU pass, N = 3D lanes ----
    qkv = jnp.dot(x, w_qkv[...], preferred_element_type=jnp.float32) + b_qkv[...]  # [S, 3D]

    # additive attention mask (1 = keep, 0 = pad)
    # TODO(synk): guard fully-masked rows (all-pad) if that case can occur.
    neg = (1.0 - mask_ref[0, 0]) * (-1e9)                       # [S]

    # ---- multi-head self-attention; heads sliced in-kernel on the lane axis.
    # Output projection is accumulated per head (block-matmul identity), which
    # avoids any concat/transpose/reshape layout ops inside the kernel.
    wo_v = wo[...]                                              # [D, D]
    ctx = jnp.zeros((S, D), jnp.float32)
    for h in range(H):
        qh = qkv[:, h * DH:(h + 1) * DH]                        # [S, DH]
        kh = qkv[:, D + h * DH:D + (h + 1) * DH]                # [S, DH]
        vh = qkv[:, 2 * D + h * DH:2 * D + (h + 1) * DH]        # [S, DH]
        s = jnp.einsum("qd,kd->qk", qh, kh,
                       preferred_element_type=jnp.float32) * scale   # [S, S]
        s = s + neg[None, :]
        m = jnp.max(s, axis=-1, keepdims=True)
        p = jnp.exp(s - m)
        denom = jnp.sum(p, axis=-1, keepdims=True)
        p = p * pl.reciprocal(denom, approx=True)               # EUP, not a VALU divide
        oh = jnp.dot(p, vh, preferred_element_type=jnp.float32)        # [S, DH]
        ctx = ctx + jnp.dot(oh, wo_v[h * DH:(h + 1) * DH, :],
                            preferred_element_type=jnp.float32)        # [S, D]
    attn_out = ctx + bo[...]
    x = _ln(x + attn_out, ln1_g[...], ln1_b[...], eps)

    # ---- feed-forward ----
    # TODO(synk): exact erf GELU (approximate=False) for bit-parity with torch.nn.GELU.
    ff = jax.nn.gelu(jnp.dot(x, w1[...], preferred_element_type=jnp.float32) + b1[...])
    ff = jnp.dot(ff, w2[...], preferred_element_type=jnp.float32) + b2[...]
    x = _ln(x + ff, ln2_g[...], ln2_b[...], eps)                # last_hidden_state [S, D]

    # ---- BGE-M3 sparse head: relu(x @ w_sparse + b), stored LANE-DENSE as [1, S].
    # Contract D (w_sp is the [1, D] weight row), so the store puts tokens on the
    # lane axis instead of an N=1 matmul with a masked single-lane writeback.
    sv = jnp.einsum("od,sd->os", w_sp[...], x,
                    preferred_element_type=jnp.float32)         # [1, S]
    o_ref[0] = jnp.maximum(sv + b_sp[...], 0.0).astype(o_ref.dtype)


# ---------------- parameters (deterministic, synthetic) ----------------
def init_params(key):
    ks = jax.random.split(key, 16)
    n = lambda k, shape, s=0.02: (s * jax.random.normal(k, shape)).astype(jnp.float32)
    return {
        "embed": n(ks[0], (VOCAB, D)),
        "pos_embed": n(ks[1], (S, D)),
        "ln_emb_g": jnp.ones((1, D), jnp.float32),
        "ln_emb_b": jnp.zeros((1, D), jnp.float32),
        "w_qkv": n(ks[2], (D, 3 * D)),                 # fused Q|K|V
        "b_qkv": jnp.zeros((1, 3 * D), jnp.float32),
        "wo": n(ks[3], (D, D)), "bo": jnp.zeros((1, D), jnp.float32),
        "ln1_g": jnp.ones((1, D), jnp.float32),
        "ln1_b": jnp.zeros((1, D), jnp.float32),
        "w1": n(ks[4], (D, FFN)), "b1": jnp.zeros((1, FFN), jnp.float32),
        "w2": n(ks[5], (FFN, D)), "b2": jnp.zeros((1, D), jnp.float32),
        "ln2_g": jnp.ones((1, D), jnp.float32),
        "ln2_b": jnp.zeros((1, D), jnp.float32),
        "w_sparse": n(ks[6], (1, D)),                  # row form for lane-dense head
        "b_sparse": jnp.zeros((1, 1), jnp.float32),
    }


# ---------------- forward (wrapper semantics) ----------------
@jax.jit
def sparse_embedding_forward(params, input_ids, attention_mask):
    # token-embedding gather stays in XLA (glue); everything else is one kernel
    tok = jnp.take(params["embed"], input_ids, axis=0)          # [B, S, D]
    mask_f = attention_mask.astype(jnp.float32).reshape(B, 1, S)

    w2d = lambda a: pl.BlockSpec(a.shape, lambda b: (0, 0))     # broadcast weight block

    sparse_row = pl.pallas_call(
        functools.partial(_fused_encoder_sparse_kernel,
                          scale=1.0 / math.sqrt(DH), eps=EPS),
        out_shape=jax.ShapeDtypeStruct((B, 1, S), jnp.float32),
        grid=(B,),
        in_specs=[
            pl.BlockSpec((1, S, D), lambda b: (b, 0, 0)),       # token embeddings
            w2d(params["pos_embed"]),                           # positional embeddings
            pl.BlockSpec((1, 1, S), lambda b: (b, 0, 0)),       # attention mask
            w2d(params["ln_emb_g"]), w2d(params["ln_emb_b"]),
            w2d(params["w_qkv"]), w2d(params["b_qkv"]),
            w2d(params["wo"]), w2d(params["bo"]),
            w2d(params["ln1_g"]), w2d(params["ln1_b"]),
            w2d(params["w1"]), w2d(params["b1"]),
            w2d(params["w2"]), w2d(params["b2"]),
            w2d(params["ln2_g"]), w2d(params["ln2_b"]),
            w2d(params["w_sparse"]), w2d(params["b_sparse"]),
        ],
        out_specs=pl.BlockSpec((1, 1, S), lambda b: (b, 0, 0)),
        compiler_params=pltpu.CompilerParams(dimension_semantics=("parallel",)),
    )(tok, params["pos_embed"], mask_f,
      params["ln_emb_g"], params["ln_emb_b"],
      params["w_qkv"], params["b_qkv"], params["wo"], params["bo"],
      params["ln1_g"], params["ln1_b"],
      params["w1"], params["b1"], params["w2"], params["b2"],
      params["ln2_g"], params["ln2_b"],
      params["w_sparse"], params["b_sparse"])

    # [B, 1, S] -> [B, S, 1]  (pure reshape; element order identical)
    return sparse_row.reshape(B, S, 1)


if __name__ == "__main__":
    key = jax.random.PRNGKey(0)
    pkey, ikey = jax.random.split(key)
    params = init_params(pkey)

    input_ids = jax.random.randint(ikey, (B, S), 0, VOCAB, dtype=jnp.int32)
    attention_mask = jnp.array(
        [[1, 1, 1, 1, 1, 1, 1, 1],
         [1, 1, 1, 1, 1, 0, 0, 0]], dtype=jnp.int32)

    sparse_vecs = sparse_embedding_forward(params, input_ids, attention_mask)
    jax.block_until_ready(sparse_vecs)
    assert sparse_vecs.shape == (B, S, 1) and sparse_vecs.dtype == jnp.float32
    assert bool(jnp.all(sparse_vecs >= 0.0))   # ReLU output
    print("KERNEL_OK")
</pallas_src>

<mosaic_0001>
module attributes {stable_mosaic.version = 11 : i64} {
  func.func @_fused_encoder_sparse_kernel(%arg0: i32, %arg1: memref<1x8x32xf32, #tpu.memory_space<vmem>>, %arg2: memref<8x32xf32, #tpu.memory_space<vmem>>, %arg3: memref<1x1x8xf32, #tpu.memory_space<vmem>>, %arg4: memref<1x32xf32, #tpu.memory_space<vmem>>, %arg5: memref<1x32xf32, #tpu.memory_space<vmem>>, %arg6: memref<32x96xf32, #tpu.memory_space<vmem>>, %arg7: memref<1x96xf32, #tpu.memory_space<vmem>>, %arg8: memref<32x32xf32, #tpu.memory_space<vmem>>, %arg9: memref<1x32xf32, #tpu.memory_space<vmem>>, %arg10: memref<1x32xf32, #tpu.memory_space<vmem>>, %arg11: memref<1x32xf32, #tpu.memory_space<vmem>>, %arg12: memref<32x64xf32, #tpu.memory_space<vmem>>, %arg13: memref<1x64xf32, #tpu.memory_space<vmem>>, %arg14: memref<64x32xf32, #tpu.memory_space<vmem>>, %arg15: memref<1x32xf32, #tpu.memory_space<vmem>>, %arg16: memref<1x32xf32, #tpu.memory_space<vmem>>, %arg17: memref<1x32xf32, #tpu.memory_space<vmem>>, %arg18: memref<1x32xf32, #tpu.memory_space<vmem>>, %arg19: memref<1x1xf32, #tpu.memory_space<vmem>>, %arg20: memref<1x1x8xf32, #tpu.memory_space<vmem>>) attributes {dimension_semantics = [#tpu.dimension_semantics<parallel>], iteration_bounds = array<i64: 2>, scalar_prefetch = 0 : i64, scratch_operands = 0 : i64, tpu.core_type = #tpu.core_type<tc>, window_params = [{transform_indices = @transform_0, window_bounds = array<i64: 1, 8, 32>}, {pipeline_mode = #tpu.pipeline_mode<synchronous>, transform_indices = @transform_1, window_bounds = array<i64: 8, 32>}, {transform_indices = @transform_2, window_bounds = array<i64: 1, 1, 8>}, {pipeline_mode = #tpu.pipeline_mode<synchronous>, transform_indices = @transform_3, window_bounds = array<i64: 1, 32>}, {pipeline_mode = #tpu.pipeline_mode<synchronous>, transform_indices = @transform_4, window_bounds = array<i64: 1, 32>}, {pipeline_mode = #tpu.pipeline_mode<synchronous>, transform_indices = @transform_5, window_bounds = array<i64: 32, 96>}, {pipeline_mode = #tpu.pipeline_mode<synchronous>, transform_indices = @transform_6, window_bounds = array<i64: 1, 96>}, {pipeline_mode = #tpu.pipeline_mode<synchronous>, transform_indices = @transform_7, window_bounds = array<i64: 32, 32>}, {pipeline_mode = #tpu.pipeline_mode<synchronous>, transform_indices = @transform_8, window_bounds = array<i64: 1, 32>}, {pipeline_mode = #tpu.pipeline_mode<synchronous>, transform_indices = @transform_9, window_bounds = array<i64: 1, 32>}, {pipeline_mode = #tpu.pipeline_mode<synchronous>, transform_indices = @transform_10, window_bounds = array<i64: 1, 32>}, {pipeline_mode = #tpu.pipeline_mode<synchronous>, transform_indices = @transform_11, window_bounds = array<i64: 32, 64>}, {pipeline_mode = #tpu.pipeline_mode<synchronous>, transform_indices = @transform_12, window_bounds = array<i64: 1, 64>}, {pipeline_mode = #tpu.pipeline_mode<synchronous>, transform_indices = @transform_13, window_bounds = array<i64: 64, 32>}, {pipeline_mode = #tpu.pipeline_mode<synchronous>, transform_indices = @transform_14, window_bounds = array<i64: 1, 32>}, {pipeline_mode = #tpu.pipeline_mode<synchronous>, transform_indices = @transform_15, window_bounds = array<i64: 1, 32>}, {pipeline_mode = #tpu.pipeline_mode<synchronous>, transform_indices = @transform_16, window_bounds = array<i64: 1, 32>}, {pipeline_mode = #tpu.pipeline_mode<synchronous>, transform_indices = @transform_17, window_bounds = array<i64: 1, 32>}, {pipeline_mode = #tpu.pipeline_mode<synchronous>, transform_indices = @transform_18, window_bounds = array<i64: 1, 1>}, {transform_indices = @transform_19, window_bounds = array<i64: 1, 1, 8>}]} {
    %c0 = arith.constant 0 : index
    %c0_0 = arith.constant 0 : index
    %c0_1 = arith.constant 0 : index
    %0 = vector.load %arg1[%c0, %c0_0, %c0_1] : memref<1x8x32xf32, #tpu.memory_space<vmem>>, vector<1x8x32xf32>
    %1 = vector.shape_cast %0 : vector<1x8x32xf32> to vector<8x32xf32>
    %c0_2 = arith.constant 0 : index
    %c0_3 = arith.constant 0 : index
    %2 = vector.load %arg2[%c0_2, %c0_3] : memref<8x32xf32, #tpu.memory_space<vmem>>, vector<8x32xf32>
    %3 = arith.addf %1, %2 : vector<8x32xf32>
    %c0_4 = arith.constant 0 : index
    %c0_5 = arith.constant 0 : index
    %4 = vector.load %arg4[%c0_4, %c0_5] : memref<1x32xf32, #tpu.memory_space<vmem>>, vector<1x32xf32>
    %c0_6 = arith.constant 0 : index
    %c0_7 = arith.constant 0 : index
    %5 = vector.load %arg5[%c0_6, %c0_7] : memref<1x32xf32, #tpu.memory_space<vmem>>, vector<1x32xf32>
    %cst = arith.constant dense<0.000000e+00> : vector<8xf32>
    %6 = vector.multi_reduction <add>, %3, %cst [1] : vector<8x32xf32> to vector<8xf32>
    %7 = vector.shape_cast %6 : vector<8xf32> to vector<8x1xf32>
    %cst_8 = arith.constant 3.200000e+01 : f32
    %8 = vector.broadcast %cst_8 : f32 to vector<8x1xf32>
    %9 = arith.divf %7, %8 : vector<8x1xf32>
    %10 = vector.broadcast %9 : vector<8x1xf32> to vector<8x32xf32>
    %11 = arith.subf %3, %10 : vector<8x32xf32>
    %12 = arith.mulf %11, %11 : vector<8x32xf32>
    %cst_9 = arith.constant dense<0.000000e+00> : vector<8xf32>
    %13 = vector.multi_reduction <add>, %12, %cst_9 [1] : vector<8x32xf32> to vector<8xf32>
    %14 = vector.shape_cast %13 : vector<8xf32> to vector<8x1xf32>
    %cst_10 = arith.constant 3.200000e+01 : f32
    %15 = vector.broadcast %cst_10 : f32 to vector<8x1xf32>
    %16 = arith.divf %14, %15 : vector<8x1xf32>
    %17 = vector.broadcast %9 : vector<8x1xf32> to vector<8x32xf32>
    %18 = arith.subf %3, %17 : vector<8x32xf32>
    %cst_11 = arith.constant 9.99999974E-6 : f32
    %19 = vector.broadcast %cst_11 : f32 to vector<8x1xf32>
    %20 = arith.addf %16, %19 : vector<8x1xf32>
    %21 = math.rsqrt %20 : vector<8x1xf32>
    %22 = vector.broadcast %21 : vector<8x1xf32> to vector<8x32xf32>
    %23 = arith.mulf %18, %22 : vector<8x32xf32>
    %24 = vector.broadcast %4 : vector<1x32xf32> to vector<8x32xf32>
    %25 = arith.mulf %23, %24 : vector<8x32xf32>
    %26 = vector.broadcast %5 : vector<1x32xf32> to vector<8x32xf32>
    %27 = arith.addf %25, %26 : vector<8x32xf32>
    %c0_12 = arith.constant 0 : index
    %c0_13 = arith.constant 0 : index
    %28 = vector.load %arg6[%c0_12, %c0_13] : memref<32x96xf32, #tpu.memory_space<vmem>>, vector<32x96xf32>
    %cst_14 = arith.constant dense<0.000000e+00> : vector<8x96xf32>
    %29 = tpu.matmul %27, %28, %cst_14 {dimension_numbers = #tpu.dot_dimension_numbers<[1], [0], [0], [1], [0, 0, 1, 1], [], []>} : vector<8x32xf32>, vector<32x96xf32>, vector<8x96xf32> -> vector<8x96xf32>
    %c0_15 = arith.constant 0 : index
    %c0_16 = arith.constant 0 : index
    %30 = vector.load %arg7[%c0_15, %c0_16] : memref<1x96xf32, #tpu.memory_space<vmem>>, vector<1x96xf32>
    %31 = vector.broadcast %30 : vector<1x96xf32> to vector<8x96xf32>
    %32 = arith.addf %29, %31 : vector<8x96xf32>
    %c0_17 = arith.constant 0 : index
    %c0_18 = arith.constant 0 : index
    %c0_19 = arith.constant 0 : index
    %33 = vector.load %arg3[%c0_17, %c0_18, %c0_19] : memref<1x1x8xf32, #tpu.memory_space<vmem>>, vector<1x1x8xf32>
    %34 = vector.shape_cast %33 : vector<1x1x8xf32> to vector<8xf32>
    %cst_20 = arith.constant 1.000000e+00 : f32
    %35 = vector.broadcast %cst_20 : f32 to vector<8xf32>
    %36 = arith.subf %35, %34 : vector<8xf32>
    %cst_21 = arith.constant -1.000000e+09 : f32
    %37 = vector.broadcast %cst_21 : f32 to vector<8xf32>
    %38 = arith.mulf %36, %37 : vector<8xf32>
    %c0_22 = arith.constant 0 : index
    %c0_23 = arith.constant 0 : index
    %39 = vector.load %arg8[%c0_22, %c0_23] : memref<32x32xf32, #tpu.memory_space<vmem>>, vector<32x32xf32>
    %cst_24 = arith.constant 0.000000e+00 : f32
    %40 = vector.broadcast %cst_24 : f32 to vector<8x32xf32>
    %41 = vector.extract_strided_slice %32 {offsets = [0, 0], sizes = [8, 8], strides = [1, 1]} : vector<8x96xf32> to vector<8x8xf32>
    %42 = vector.extract_strided_slice %32 {offsets = [0, 32], sizes = [8, 8], strides = [1, 1]} : vector<8x96xf32> to vector<8x8xf32>
    %43 = vector.extract_strided_slice %32 {offsets = [0, 64], sizes = [8, 8], strides = [1, 1]} : vector<8x96xf32> to vector<8x8xf32>
    "tpu.trace_start"() <{level = 10 : i32, message = "qd,kd->qk"}> : () -> ()
    %cst_25 = arith.constant dense<0.000000e+00> : vector<8x8xf32>
    %44 = tpu.matmul %41, %42, %cst_25 {dimension_numbers = #tpu.dot_dimension_numbers<[1], [1], [0], [0], [0, 0, 1, 0], [], []>} : vector<8x8xf32>, vector<8x8xf32>, vector<8x8xf32> -> vector<8x8xf32>
    "tpu.trace_stop"() : () -> ()
    %cst_26 = arith.constant 0.353553385 : f32
    %45 = vector.broadcast %cst_26 : f32 to vector<8x8xf32>
    %46 = arith.mulf %44, %45 : vector<8x8xf32>
    %47 = vector.shape_cast %38 : vector<8xf32> to vector<1x8xf32>
    %48 = vector.broadcast %47 : vector<1x8xf32> to vector<8x8xf32>
    %49 = arith.addf %46, %48 : vector<8x8xf32>
    %cst_27 = arith.constant dense<0xFF800000> : vector<8xf32>
    %50 = vector.multi_reduction <maximumf>, %49, %cst_27 [1] : vector<8x8xf32> to vector<8xf32>
    %51 = vector.shape_cast %50 : vector<8xf32> to vector<8x1xf32>
    %52 = vector.broadcast %51 : vector<8x1xf32> to vector<8x8xf32>
    %53 = arith.subf %49, %52 : vector<8x8xf32>
    %54 = math.exp %53 : vector<8x8xf32>
    %cst_28 = arith.constant dense<0.000000e+00> : vector<8xf32>
    %55 = vector.multi_reduction <add>, %54, %cst_28 [1] : vector<8x8xf32> to vector<8xf32>
    %56 = vector.shape_cast %55 : vector<8xf32> to vector<8x1xf32>
    %57 = tpu.reciprocal %56 {approx = true} : vector<8x1xf32> -> vector<8x1xf32>
    %58 = vector.broadcast %57 : vector<8x1xf32> to vector<8x8xf32>
    %59 = arith.mulf %54, %58 : vector<8x8xf32>
    %cst_29 = arith.constant dense<0.000000e+00> : vector<8x8xf32>
    %60 = tpu.matmul %59, %43, %cst_29 {dimension_numbers = #tpu.dot_dimension_numbers<[1], [0], [0], [1], [0, 0, 1, 1], [], []>} : vector<8x8xf32>, vector<8x8xf32>, vector<8x8xf32> -> vector<8x8xf32>
    %61 = vector.extract_strided_slice %39 {offsets = [0, 0], sizes = [8, 32], strides = [1, 1]} : vector<32x32xf32> to vector<8x32xf32>
    %cst_30 = arith.constant dense<0.000000e+00> : vector<8x32xf32>
    %62 = tpu.matmul %60, %61, %cst_30 {dimension_numbers = #tpu.dot_dimension_numbers<[1], [0], [0], [1], [0, 0, 1, 1], [], []>} : vector<8x8xf32>, vector<8x32xf32>, vector<8x32xf32> -> vector<8x32xf32>
    %63 = arith.addf %40, %62 : vector<8x32xf32>
    %64 = vector.extract_strided_slice %32 {offsets = [0, 8], sizes = [8, 8], strides = [1, 1]} : vector<8x96xf32> to vector<8x8xf32>
    %65 = vector.extract_strided_slice %32 {offsets = [0, 40], sizes = [8, 8], strides = [1, 1]} : vector<8x96xf32> to vector<8x8xf32>
    %66 = vector.extract_strided_slice %32 {offsets = [0, 72], sizes = [8, 8], strides = [1, 1]} : vector<8x96xf32> to vector<8x8xf32>
    "tpu.trace_start"() <{level = 10 : i32, message = "qd,kd->qk"}> : () -> ()
    %cst_31 = arith.constant dense<0.000000e+00> : vector<8x8xf32>
    %67 = tpu.matmul %64, %65, %cst_31 {dimension_numbers = #tpu.dot_dimension_numbers<[1], [1], [0], [0], [0, 0, 1, 0], [], []>} : vector<8x8xf32>, vector<8x8xf32>, vector<8x8xf32> -> vector<8x8xf32>
    "tpu.trace_stop"() : () -> ()
    %cst_32 = arith.constant 0.353553385 : f32
    %68 = vector.broadcast %cst_32 : f32 to vector<8x8xf32>
    %69 = arith.mulf %67, %68 : vector<8x8xf32>
    %70 = vector.shape_cast %38 : vector<8xf32> to vector<1x8xf32>
    %71 = vector.broadcast %70 : vector<1x8xf32> to vector<8x8xf32>
    %72 = arith.addf %69, %71 : vector<8x8xf32>
    %cst_33 = arith.constant dense<0xFF800000> : vector<8xf32>
    %73 = vector.multi_reduction <maximumf>, %72, %cst_33 [1] : vector<8x8xf32> to vector<8xf32>
    %74 = vector.shape_cast %73 : vector<8xf32> to vector<8x1xf32>
    %75 = vector.broadcast %74 : vector<8x1xf32> to vector<8x8xf32>
    %76 = arith.subf %72, %75 : vector<8x8xf32>
    %77 = math.exp %76 : vector<8x8xf32>
    %cst_34 = arith.constant dense<0.000000e+00> : vector<8xf32>
    %78 = vector.multi_reduction <add>, %77, %cst_34 [1] : vector<8x8xf32> to vector<8xf32>
    %79 = vector.shape_cast %78 : vector<8xf32> to vector<8x1xf32>
    %80 = tpu.reciprocal %79 {approx = true} : vector<8x1xf32> -> vector<8x1xf32>
    %81 = vector.broadcast %80 : vector<8x1xf32> to vector<8x8xf32>
    %82 = arith.mulf %77, %81 : vector<8x8xf32>
    %cst_35 = arith.constant dense<0.000000e+00> : vector<8x8xf32>
    %83 = tpu.matmul %82, %66, %cst_35 {dimension_numbers = #tpu.dot_dimension_numbers<[1], [0], [0], [1], [0, 0, 1, 1], [], []>} : vector<8x8xf32>, vector<8x8xf32>, vector<8x8xf32> -> vector<8x8xf32>
    %84 = vector.extract_strided_slice %39 {offsets = [8, 0], sizes = [8, 32], strides = [1, 1]} : vector<32x32xf32> to vector<8x32xf32>
    %cst_36 = arith.constant dense<0.000000e+00> : vector<8x32xf32>
    %85 = tpu.matmul %83, %84, %cst_36 {dimension_numbers = #tpu.dot_dimension_numbers<[1], [0], [0], [1], [0, 0, 1, 1], [], []>} : vector<8x8xf32>, vector<8x32xf32>, vector<8x32xf32> -> vector<8x32xf32>
    %86 = arith.addf %63, %85 : vector<8x32xf32>
    %87 = vector.extract_strided_slice %32 {offsets = [0, 16], sizes = [8, 8], strides = [1, 1]} : vector<8x96xf32> to vector<8x8xf32>
    %88 = vector.extract_strided_slice %32 {offsets = [0, 48], sizes = [8, 8], strides = [1, 1]} : vector<8x96xf32> to vector<8x8xf32>
    %89 = vector.extract_strided_slice %32 {offsets = [0, 80], sizes = [8, 8], strides = [1, 1]} : vector<8x96xf32> to vector<8x8xf32>
    "tpu.trace_start"() <{level = 10 : i32, message = "qd,kd->qk"}> : () -> ()
    %cst_37 = arith.constant dense<0.000000e+00> : vector<8x8xf32>
    %90 = tpu.matmul %87, %88, %cst_37 {dimension_numbers = #tpu.dot_dimension_numbers<[1], [1], [0], [0], [0, 0, 1, 0], [], []>} : vector<8x8xf32>, vector<8x8xf32>, vector<8x8xf32> -> vector<8x8xf32>
    "tpu.trace_stop"() : () -> ()
    %cst_38 = arith.constant 0.353553385 : f32
    %91 = vector.broadcast %cst_38 : f32 to vector<8x8xf32>
    %92 = arith.mulf %90, %91 : vector<8x8xf32>
    %93 = vector.shape_cast %38 : vector<8xf32> to vector<1x8xf32>
    %94 = vector.broadcast %93 : vector<1x8xf32> to vector<8x8xf32>
    %95 = arith.addf %92, %94 : vector<8x8xf32>
    %cst_39 = arith.constant dense<0xFF800000> : vector<8xf32>
    %96 = vector.multi_reduction <maximumf>, %95, %cst_39 [1] : vector<8x8xf32> to vector<8xf32>
    %97 = vector.shape_cast %96 : vector<8xf32> to vector<8x1xf32>
    %98 = vector.broadcast %97 : vector<8x1xf32> to vector<8x8xf32>
    %99 = arith.subf %95, %98 : vector<8x8xf32>
    %100 = math.exp %99 : vector<8x8xf32>
    %cst_40 = arith.constant dense<0.000000e+00> : vector<8xf32>
    %101 = vector.multi_reduction <add>, %100, %cst_40 [1] : vector<8x8xf32> to vector<8xf32>
    %102 = vector.shape_cast %101 : vector<8xf32> to vector<8x1xf32>
    %103 = tpu.reciprocal %102 {approx = true} : vector<8x1xf32> -> vector<8x1xf32>
    %104 = vector.broadcast %103 : vector<8x1xf32> to vector<8x8xf32>
    %105 = arith.mulf %100, %104 : vector<8x8xf32>
    %cst_41 = arith.constant dense<0.000000e+00> : vector<8x8xf32>
    %106 = tpu.matmul %105, %89, %cst_41 {dimension_numbers = #tpu.dot_dimension_numbers<[1], [0], [0], [1], [0, 0, 1, 1], [], []>} : vector<8x8xf32>, vector<8x8xf32>, vector<8x8xf32> -> vector<8x8xf32>
    %107 = vector.extract_strided_slice %39 {offsets = [16, 0], sizes = [8, 32], strides = [1, 1]} : vector<32x32xf32> to vector<8x32xf32>
    %cst_42 = arith.constant dense<0.000000e+00> : vector<8x32xf32>
    %108 = tpu.matmul %106, %107, %cst_42 {dimension_numbers = #tpu.dot_dimension_numbers<[1], [0], [0], [1], [0, 0, 1, 1], [], []>} : vector<8x8xf32>, vector<8x32xf32>, vector<8x32xf32> -> vector<8x32xf32>
    %109 = arith.addf %86, %108 : vector<8x32xf32>
    %110 = vector.extract_strided_slice %32 {offsets = [0, 24], sizes = [8, 8], strides = [1, 1]} : vector<8x96xf32> to vector<8x8xf32>
    %111 = vector.extract_strided_slice %32 {offsets = [0, 56], sizes = [8, 8], strides = [1, 1]} : vector<8x96xf32> to vector<8x8xf32>
    %112 = vector.extract_strided_slice %32 {offsets = [0, 88], sizes = [8, 8], strides = [1, 1]} : vector<8x96xf32> to vector<8x8xf32>
    "tpu.trace_start"() <{level = 10 : i32, message = "qd,kd->qk"}> : () -> ()
    %cst_43 = arith.constant dense<0.000000e+00> : vector<8x8xf32>
    %113 = tpu.matmul %110, %111, %cst_43 {dimension_numbers = #tpu.dot_dimension_numbers<[1], [1], [0], [0], [0, 0, 1, 0], [], []>} : vector<8x8xf32>, vector<8x8xf32>, vector<8x8xf32> -> vector<8x8xf32>
    "tpu.trace_stop"() : () -> ()
    %cst_44 = arith.constant 0.353553385 : f32
    %114 = vector.broadcast %cst_44 : f32 to vector<8x8xf32>
    %115 = arith.mulf %113, %114 : vector<8x8xf32>
    %116 = vector.shape_cast %38 : vector<8xf32> to vector<1x8xf32>
    %117 = vector.broadcast %116 : vector<1x8xf32> to vector<8x8xf32>
    %118 = arith.addf %115, %117 : vector<8x8xf32>
    %cst_45 = arith.constant dense<0xFF800000> : vector<8xf32>
    %119 = vector.multi_reduction <maximumf>, %118, %cst_45 [1] : vector<8x8xf32> to vector<8xf32>
    %120 = vector.shape_cast %119 : vector<8xf32> to vector<8x1xf32>
    %121 = vector.broadcast %120 : vector<8x1xf32> to vector<8x8xf32>
    %122 = arith.subf %118, %121 : vector<8x8xf32>
    %123 = math.exp %122 : vector<8x8xf32>
    %cst_46 = arith.constant dense<0.000000e+00> : vector<8xf32>
    %124 = vector.multi_reduction <add>, %123, %cst_46 [1] : vector<8x8xf32> to vector<8xf32>
    %125 = vector.shape_cast %124 : vector<8xf32> to vector<8x1xf32>
    %126 = tpu.reciprocal %125 {approx = true} : vector<8x1xf32> -> vector<8x1xf32>
    %127 = vector.broadcast %126 : vector<8x1xf32> to vector<8x8xf32>
    %128 = arith.mulf %123, %127 : vector<8x8xf32>
    %cst_47 = arith.constant dense<0.000000e+00> : vector<8x8xf32>
    %129 = tpu.matmul %128, %112, %cst_47 {dimension_numbers = #tpu.dot_dimension_numbers<[1], [0], [0], [1], [0, 0, 1, 1], [], []>} : vector<8x8xf32>, vector<8x8xf32>, vector<8x8xf32> -> vector<8x8xf32>
    %130 = vector.extract_strided_slice %39 {offsets = [24, 0], sizes = [8, 32], strides = [1, 1]} : vector<32x32xf32> to vector<8x32xf32>
    %cst_48 = arith.constant dense<0.000000e+00> : vector<8x32xf32>
    %131 = tpu.matmul %129, %130, %cst_48 {dimension_numbers = #tpu.dot_dimension_numbers<[1], [0], [0], [1], [0, 0, 1, 1], [], []>} : vector<8x8xf32>, vector<8x32xf32>, vector<8x32xf32> -> vector<8x32xf32>
    %132 = arith.addf %109, %131 : vector<8x32xf32>
    %c0_49 = arith.constant 0 : index
    %c0_50 = arith.constant 0 : index
    %133 = vector.load %arg9[%c0_49, %c0_50] : memref<1x32xf32, #tpu.memory_space<vmem>>, vector<1x32xf32>
    %134 = vector.broadcast %133 : vector<1x32xf32> to vector<8x32xf32>
    %135 = arith.addf %132, %134 : vector<8x32xf32>
    %136 = arith.addf %27, %135 : vector<8x32xf32>
    %c0_51 = arith.constant 0 : index
    %c0_52 = arith.constant 0 : index
    %137 = vector.load %arg10[%c0_51, %c0_52] : memref<1x32xf32, #tpu.memory_space<vmem>>, vector<1x32xf32>
    %c0_53 = arith.constant 0 : index
    %c0_54 = arith.constant 0 : index
    %138 = vector.load %arg11[%c0_53, %c0_54] : memref<1x32xf32, #tpu.memory_space<vmem>>, vector<1x32xf32>
    %cst_55 = arith.constant dense<0.000000e+00> : vector<8xf32>
    %139 = vector.multi_reduction <add>, %136, %cst_55 [1] : vector<8x32xf32> to vector<8xf32>
    %140 = vector.shape_cast %139 : vector<8xf32> to vector<8x1xf32>
    %cst_56 = arith.constant 3.200000e+01 : f32
    %141 = vector.broadcast %cst_56 : f32 to vector<8x1xf32>
    %142 = arith.divf %140, %141 : vector<8x1xf32>
    %143 = vector.broadcast %142 : vector<8x1xf32> to vector<8x32xf32>
    %144 = arith.subf %136, %143 : vector<8x32xf32>
    %145 = arith.mulf %144, %144 : vector<8x32xf32>
    %cst_57 = arith.constant dense<0.000000e+00> : vector<8xf32>
    %146 = vector.multi_reduction <add>, %145, %cst_57 [1] : vector<8x32xf32> to vector<8xf32>
    %147 = vector.shape_cast %146 : vector<8xf32> to vector<8x1xf32>
    %cst_58 = arith.constant 3.200000e+01 : f32
    %148 = vector.broadcast %cst_58 : f32 to vector<8x1xf32>
    %149 = arith.divf %147, %148 : vector<8x1xf32>
    %150 = vector.broadcast %142 : vector<8x1xf32> to vector<8x32xf32>
    %151 = arith.subf %136, %150 : vector<8x32xf32>
    %cst_59 = arith.constant 9.99999974E-6 : f32
    %152 = vector.broadcast %cst_59 : f32 to vector<8x1xf32>
    %153 = arith.addf %149, %152 : vector<8x1xf32>
    %154 = math.rsqrt %153 : vector<8x1xf32>
    %155 = vector.broadcast %154 : vector<8x1xf32> to vector<8x32xf32>
    %156 = arith.mulf %151, %155 : vector<8x32xf32>
    %157 = vector.broadcast %137 : vector<1x32xf32> to vector<8x32xf32>
    %158 = arith.mulf %156, %157 : vector<8x32xf32>
    %159 = vector.broadcast %138 : vector<1x32xf32> to vector<8x32xf32>
    %160 = arith.addf %158, %159 : vector<8x32xf32>
    %c0_60 = arith.constant 0 : index
    %c0_61 = arith.constant 0 : index
    %161 = vector.load %arg12[%c0_60, %c0_61] : memref<32x64xf32, #tpu.memory_space<vmem>>, vector<32x64xf32>
    %cst_62 = arith.constant dense<0.000000e+00> : vector<8x64xf32>
    %162 = tpu.matmul %160, %161, %cst_62 {dimension_numbers = #tpu.dot_dimension_numbers<[1], [0], [0], [1], [0, 0, 1, 1], [], []>} : vector<8x32xf32>, vector<32x64xf32>, vector<8x64xf32> -> vector<8x64xf32>
    %c0_63 = arith.constant 0 : index
    %c0_64 = arith.constant 0 : index
    %163 = vector.load %arg13[%c0_63, %c0_64] : memref<1x64xf32, #tpu.memory_space<vmem>>, vector<1x64xf32>
    %164 = vector.broadcast %163 : vector<1x64xf32> to vector<8x64xf32>
    %165 = arith.addf %162, %164 : vector<8x64xf32>
    %166 = arith.mulf %165, %165 : vector<8x64xf32>
    %167 = arith.mulf %165, %166 : vector<8x64xf32>
    %cst_65 = arith.constant 4.471500e-02 : f32
    %168 = vector.broadcast %cst_65 : f32 to vector<8x64xf32>
    %169 = arith.mulf %168, %167 : vector<8x64xf32>
    %170 = arith.addf %165, %169 : vector<8x64xf32>
    %cst_66 = arith.constant 0.797884583 : f32
    %171 = vector.broadcast %cst_66 : f32 to vector<8x64xf32>
    %172 = arith.mulf %171, %170 : vector<8x64xf32>
    %173 = math.tanh %172 : vector<8x64xf32>
    %cst_67 = arith.constant 1.000000e+00 : f32
    %174 = vector.broadcast %cst_67 : f32 to vector<8x64xf32>
    %175 = arith.addf %174, %173 : vector<8x64xf32>
    %cst_68 = arith.constant 5.000000e-01 : f32
    %176 = vector.broadcast %cst_68 : f32 to vector<8x64xf32>
    %177 = arith.mulf %176, %175 : vector<8x64xf32>
    %178 = arith.mulf %165, %177 : vector<8x64xf32>
    %c0_69 = arith.constant 0 : index
    %c0_70 = arith.constant 0 : index
    %179 = vector.load %arg14[%c0_69, %c0_70] : memref<64x32xf32, #tpu.memory_space<vmem>>, vector<64x32xf32>
    %cst_71 = arith.constant dense<0.000000e+00> : vector<8x32xf32>
    %180 = tpu.matmul %178, %179, %cst_71 {dimension_numbers = #tpu.dot_dimension_numbers<[1], [0], [0], [1], [0, 0, 1, 1], [], []>} : vector<8x64xf32>, vector<64x32xf32>, vector<8x32xf32> -> vector<8x32xf32>
    %c0_72 = arith.constant 0 : index
    %c0_73 = arith.constant 0 : index
    %181 = vector.load %arg15[%c0_72, %c0_73] : memref<1x32xf32, #tpu.memory_space<vmem>>, vector<1x32xf32>
    %182 = vector.broadcast %181 : vector<1x32xf32> to vector<8x32xf32>
    %183 = arith.addf %180, %182 : vector<8x32xf32>
    %184 = arith.addf %160, %183 : vector<8x32xf32>
    %c0_74 = arith.constant 0 : index
    %c0_75 = arith.constant 0 : index
    %185 = vector.load %arg16[%c0_74, %c0_75] : memref<1x32xf32, #tpu.memory_space<vmem>>, vector<1x32xf32>
    %c0_76 = arith.constant 0 : index
    %c0_77 = arith.constant 0 : index
    %186 = vector.load %arg17[%c0_76, %c0_77] : memref<1x32xf32, #tpu.memory_space<vmem>>, vector<1x32xf32>
    %cst_78 = arith.constant dense<0.000000e+00> : vector<8xf32>
    %187 = vector.multi_reduction <add>, %184, %cst_78 [1] : vector<8x32xf32> to vector<8xf32>
    %188 = vector.shape_cast %187 : vector<8xf32> to vector<8x1xf32>
    %cst_79 = arith.constant 3.200000e+01 : f32
    %189 = vector.broadcast %cst_79 : f32 to vector<8x1xf32>
    %190 = arith.divf %188, %189 : vector<8x1xf32>
    %191 = vector.broadcast %190 : vector<8x1xf32> to vector<8x32xf32>
    %192 = arith.subf %184, %191 : vector<8x32xf32>
    %193 = arith.mulf %192, %192 : vector<8x32xf32>
    %cst_80 = arith.constant dense<0.000000e+00> : vector<8xf32>
    %194 = vector.multi_reduction <add>, %193, %cst_80 [1] : vector<8x32xf32> to vector<8xf32>
    %195 = vector.shape_cast %194 : vector<8xf32> to vector<8x1xf32>
    %cst_81 = arith.constant 3.200000e+01 : f32
    %196 = vector.broadcast %cst_81 : f32 to vector<8x1xf32>
    %197 = arith.divf %195, %196 : vector<8x1xf32>
    %198 = vector.broadcast %190 : vector<8x1xf32> to vector<8x32xf32>
    %199 = arith.subf %184, %198 : vector<8x32xf32>
    %cst_82 = arith.constant 9.99999974E-6 : f32
    %200 = vector.broadcast %cst_82 : f32 to vector<8x1xf32>
    %201 = arith.addf %197, %200 : vector<8x1xf32>
    %202 = math.rsqrt %201 : vector<8x1xf32>
    %203 = vector.broadcast %202 : vector<8x1xf32> to vector<8x32xf32>
    %204 = arith.mulf %199, %203 : vector<8x32xf32>
    %205 = vector.broadcast %185 : vector<1x32xf32> to vector<8x32xf32>
    %206 = arith.mulf %204, %205 : vector<8x32xf32>
    %207 = vector.broadcast %186 : vector<1x32xf32> to vector<8x32xf32>
    %208 = arith.addf %206, %207 : vector<8x32xf32>
    %c0_83 = arith.constant 0 : index
    %c0_84 = arith.constant 0 : index
    %209 = vector.load %arg18[%c0_83, %c0_84] : memref<1x32xf32, #tpu.memory_space<vmem>>, vector<1x32xf32>
    "tpu.trace_start"() <{level = 10 : i32, message = "od,sd->os"}> : () -> ()
    %cst_85 = arith.constant dense<0.000000e+00> : vector<1x8xf32>
    %210 = tpu.matmul %209, %208, %cst_85 {dimension_numbers = #tpu.dot_dimension_numbers<[1], [1], [0], [0], [0, 0, 1, 0], [], []>} : vector<1x32xf32>, vector<8x32xf32>, vector<1x8xf32> -> vector<1x8xf32>
    "tpu.trace_stop"() : () -> ()
    %c0_86 = arith.constant 0 : index
    %c0_87 = arith.constant 0 : index
    %211 = vector.load %arg19[%c0_86, %c0_87] : memref<1x1xf32, #tpu.memory_space<vmem>>, vector<1x1xf32>
    %212 = vector.broadcast %211 : vector<1x1xf32> to vector<1x8xf32>
    %213 = arith.addf %210, %212 : vector<1x8xf32>
    %cst_88 = arith.constant 0.000000e+00 : f32
    %214 = vector.broadcast %cst_88 : f32 to vector<1x8xf32>
    %215 = arith.maximumf %213, %214 : vector<1x8xf32>
    %c0_89 = arith.constant 0 : index
    %c0_90 = arith.constant 0 : index
    %c0_91 = arith.constant 0 : index
    %216 = vector.load %arg20[%c0_89, %c0_90, %c0_91] : memref<1x1x8xf32, #tpu.memory_space<vmem>>, vector<1x1x8xf32>
    %217 = vector.shape_cast %216 : vector<1x1x8xf32> to vector<1x8xf32>
    %218 = vector.shape_cast %215 : vector<1x8xf32> to vector<1x1x8xf32>
    tpu.vector_store %arg20[%c0_89, %c0_90, %c0_91], %218 {strides = array<i32>} : memref<1x1x8xf32, #tpu.memory_space<vmem>>, vector<1x1x8xf32>,
    return
  }
  func.func @transform_0(%arg0: i32) -> (i32, i32, i32) {
    %c0_i32 = arith.constant 0 : i32
    %c0_i32_0 = arith.constant 0 : i32
    %c0_i32_1 = arith.constant 0 : i32
    return %arg0, %c0_i32, %c0_i32_0 : i32, i32, i32
  }
  func.func @transform_1(%arg0: i32) -> (i32, i32) {
    %c0_i32 = arith.constant 0 : i32
    %c0_i32_0 = arith.constant 0 : i32
    %c0_i32_1 = arith.constant 0 : i32
    return %c0_i32, %c0_i32_0 : i32, i32
  }
  func.func @transform_2(%arg0: i32) -> (i32, i32, i32) {
    %c0_i32 = arith.constant 0 : i32
    %c0_i32_0 = arith.constant 0 : i32
    %c0_i32_1 = arith.constant 0 : i32
    return %arg0, %c0_i32, %c0_i32_0 : i32, i32, i32
  }
  func.func @transform_3(%arg0: i32) -> (i32, i32) {
    %c0_i32 = arith.constant 0 : i32
    %c0_i32_0 = arith.constant 0 : i32
    %c0_i32_1 = arith.constant 0 : i32
    return %c0_i32, %c0_i32_0 : i32, i32
  }
  func.func @transform_4(%arg0: i32) -> (i32, i32) {
    %c0_i32 = arith.constant 0 : i32
    %c0_i32_0 = arith.constant 0 : i32
    %c0_i32_1 = arith.constant 0 : i32
    return %c0_i32, %c0_i32_0 : i32, i32
  }
  func.func @transform_5(%arg0: i32) -> (i32, i32) {
    %c0_i32 = arith.constant 0 : i32
    %c0_i32_0 = arith.constant 0 : i32
    %c0_i32_1 = arith.constant 0 : i32
    return %c0_i32, %c0_i32_0 : i32, i32
  }
  func.func @transform_6(%arg0: i32) -> (i32, i32) {
    %c0_i32 = arith.constant 0 : i32
    %c0_i32_0 = arith.constant 0 : i32
    %c0_i32_1 = arith.constant 0 : i32
    return %c0_i32, %c0_i32_0 : i32, i32
  }
  func.func @transform_7(%arg0: i32) -> (i32, i32) {
    %c0_i32 = arith.constant 0 : i32
    %c0_i32_0 = arith.constant 0 : i32
    %c0_i32_1 = arith.constant 0 : i32
    return %c0_i32, %c0_i32_0 : i32, i32
  }
  func.func @transform_8(%arg0: i32) -> (i32, i32) {
    %c0_i32 = arith.constant 0 : i32
    %c0_i32_0 = arith.constant 0 : i32
    %c0_i32_1 = arith.constant 0 : i32
    return %c0_i32, %c0_i32_0 : i32, i32
  }
  func.func @transform_9(%arg0: i32) -> (i32, i32) {
    %c0_i32 = arith.constant 0 : i32
    %c0_i32_0 = arith.constant 0 : i32
    %c0_i32_1 = arith.constant 0 : i32
    return %c0_i32, %c0_i32_0 : i32, i32
  }
  func.func @transform_10(%arg0: i32) -> (i32, i32) {
    %c0_i32 = arith.constant 0 : i32
    %c0_i32_0 = arith.constant 0 : i32
    %c0_i32_1 = arith.constant 0 : i32
    return %c0_i32, %c0_i32_0 : i32, i32
  }
  func.func @transform_11(%arg0: i32) -> (i32, i32) {
    %c0_i32 = arith.constant 0 : i32
    %c0_i32_0 = arith.constant 0 : i32
    %c0_i32_1 = arith.constant 0 : i32
    return %c0_i32, %c0_i32_0 : i32, i32
  }
  func.func @transform_12(%arg0: i32) -> (i32, i32) {
    %c0_i32 = arith.constant 0 : i32
    %c0_i32_0 = arith.constant 0 : i32
    %c0_i32_1 = arith.constant 0 : i32
    return %c0_i32, %c0_i32_0 : i32, i32
  }
  func.func @transform_13(%arg0: i32) -> (i32, i32) {
    %c0_i32 = arith.constant 0 : i32
    %c0_i32_0 = arith.constant 0 : i32
    %c0_i32_1 = arith.constant 0 : i32
    return %c0_i32, %c0_i32_0 : i32, i32
  }
  func.func @transform_14(%arg0: i32) -> (i32, i32) {
    %c0_i32 = arith.constant 0 : i32
    %c0_i32_0 = arith.constant 0 : i32
    %c0_i32_1 = arith.constant 0 : i32
    return %c0_i32, %c0_i32_0 : i32, i32
  }
  func.func @transform_15(%arg0: i32) -> (i32, i32) {
    %c0_i32 = arith.constant 0 : i32
    %c0_i32_0 = arith.constant 0 : i32
    %c0_i32_1 = arith.constant 0 : i32
    return %c0_i32, %c0_i32_0 : i32, i32
  }
  func.func @transform_16(%arg0: i32) -> (i32, i32) {
    %c0_i32 = arith.constant 0 : i32
    %c0_i32_0 = arith.constant 0 : i32
    %c0_i32_1 = arith.constant 0 : i32
    return %c0_i32, %c0_i32_0 : i32, i32
  }
  func.func @transform_17(%arg0: i32) -> (i32, i32) {
    %c0_i32 = arith.constant 0 : i32
    %c0_i32_0 = arith.constant 0 : i32
    %c0_i32_1 = arith.constant 0 : i32
    return %c0_i32, %c0_i32_0 : i32, i32
  }
  func.func @transform_18(%arg0: i32) -> (i32, i32) {
    %c0_i32 = arith.constant 0 : i32
    %c0_i32_0 = arith.constant 0 : i32
    %c0_i32_1 = arith.constant 0 : i32
    return %c0_i32, %c0_i32_0 : i32, i32
  }
  func.func @transform_19(%arg0: i32) -> (i32, i32, i32) {
    %c0_i32 = arith.constant 0 : i32
    %c0_i32_0 = arith.constant 0 : i32
    %c0_i32_1 = arith.constant 0 : i32
    return %arg0, %c0_i32, %c0_i32_0 : i32, i32, i32
  }
}

</mosaic_0001>

<bundles_post_ra>
// kernel: sparse_embedding_forward.1
= control target key start
LH: loop header
LB: loop body
LE: loop exit
PB: predicated region body
PF: predicated region fallthrough
CT: control target
= control target key end

     0   :  { %s2921_s0 = inlined_call_operand.vmem [shape: f32[2,8,32], index: 0, kind: input, shape index: {}]   ;;  %s2922_s1 = inlined_call_operand.vmem [shape: f32[8,32], index: 1, kind: input, shape index: {}]   ;;  %s2923_s2 = inlined_call_operand.vmem [shape: f32[2,1,8], index: 2, kind: input, shape index: {}]   ;;  %s2924_s3 = inlined_call_operand.vmem [shape: f32[1,32], index: 3, kind: input, shape index: {}]   ;;  %s2925_s4 = inlined_call_operand.vmem [shape: f32[1,32], index: 4, kind: input, shape index: {}]   ;;  %s2926_s5 = inlined_call_operand.vmem [shape: f32[32,96], index: 5, kind: input, shape index: {}]   ;;  %s2927_s6 = inlined_call_operand.vmem [shape: f32[1,96], index: 6, kind: input, shape index: {}]   ;;  %s2928_s7 = inlined_call_operand.vmem [shape: f32[32,32], index: 7, kind: input, shape index: {}]   ;;  %s2929_s8 = inlined_call_operand.vmem [shape: f32[1,32], index: 8, kind: input, shape index: {}]   ;;  %s2930_s9 = inlined_call_operand.vmem [shape: f32[1,32], index: 9, kind: input, shape index: {}]   ;;  %s2931_s10 = inlined_call_operand.vmem [shape: f32[1,32], index: 10, kind: input, shape index: {}]   ;;  %s2932_s11 = inlined_call_operand.vmem [shape: f32[32,64], index: 11, kind: input, shape index: {}]   ;;  %s2933_s12 = inlined_call_operand.vmem [shape: f32[1,64], index: 12, kind: input, shape index: {}]   ;;  %s2934_s13 = inlined_call_operand.vmem [shape: f32[64,32], index: 13, kind: input, shape index: {}]   ;;  %s2935_s14 = inlined_call_operand.vmem [shape: f32[1,32], index: 14, kind: input, shape index: {}]   ;;  %s2936_s15 = inlined_call_operand.vmem [shape: f32[1,32], index: 15, kind: input, shape index: {}]   ;;  %s2937_s16 = inlined_call_operand.vmem [shape: f32[1,32], index: 16, kind: input, shape index: {}]   ;;  %s2938_s17 = inlined_call_operand.vmem [shape: f32[1,32], index: 17, kind: input, shape index: {}]   ;;  %s2939_s18 = inlined_call_operand.<no memory space> [shape: f32[1,1], index: 18, kind: input, shape index: {}]   ;;  %s2940_s19 = inlined_call_operand.hbm [shape: f32[2,1,8], index: 19, kind: output, shape index: {}]  }
   0x1   :  { %2944 = sst [smem:[#allocation9_spill]] %s2921_s0  ;;  %v24_v0 = vstv %s2939_s18 }
   0x2   :  { %2945 = sst [smem:[#allocation10_spill]] %s2922_s1  ;;  %25 = vst [vmem:[#allocation2] sm:$0x1] %v24_v0 }
   0x3   :  { %2946 = sst [smem:[#allocation11_spill]] %s2923_s2 }
   0x4   :  { %2947 = sst [smem:[#allocation12_spill]] %s2924_s3 }
   0x5   :  { %2948 = sst [smem:[#allocation13_spill]] %s2925_s4 }
   0x6   :  { %26 = vsyncpa [#allocation4], 0 }
   0x7   :  { %28 = vsyncpa [#allocation4 + $0x1], 0  ;;  %s2600_s20 = smov 0   ;;  %s2602_s21 = smov 0  }
   0x8   :  { %s2604_s1 = smov 0   ;;  %s2606_s22 = smov 0  }
   0x9 LB: > { %2949 = sst [smem:[#allocation6_spill]] %s2475_s1  ;;  %s2621_s18 = sadd.s32 4294967295, %s2479_s22   ;;  %s2479_s22 = sphi %s2606_s22, %s2959_s22   ;;  %s2475_s1 = sphi %s2604_s1, %s2961_s1   ;;  %s2471_s21 = sphi %s2602_s21, %s2963_s21   ;;  %s2467_s20 = sphi %s2600_s20, %s2962_s20  }
   0xa   : > { %s2123_s2 = sadd.s32 4294967294, %s2479_s22   ;;  %s2625_s23 = sadd.s32 1, %s2479_s22  }
   0xb   : > { %2950 = sst [smem:[#allocation7_spill]] %s2625_s23  ;;  %s450_s24 = sadd.s32 1, %s2475_s1 }
   0xc   : > { %s447_s25 = ssub.s32 %s2479_s22, %s2625_s23  ;;  %p460_p0 = scmp.ne.s32.totalorder %s2475_s1, %s2471_s21 }
   0xd   : > { %p448_p1 = scmp.eq.s32.totalorder %s447_s25, 0  ;;  %p461_p2 = scmp.eq.s32.totalorder %s2621_s18, 1 }
   0xe   : > { %p466_p3 = scmp.ne.s32.totalorder %s2471_s21, %s2467_s20  ;;  %p467_p4 = scmp.eq.s32.totalorder %s2123_s2, 1 }
   0xf   : > { %s2636_s3 = scalar_select %p448_p1, %s2475_s1, %s450_s24  }
  0x10   : > { %p2638_p5 = por %p461_p2, %p460_p0  ;;  %p2642_p6 = por %p467_p4, %p466_p3 }
  0x11   : > { %2951 = sst [smem:[#allocation8_spill]] %s2636_s3  ;;  %p2126_p7 = scmp.ge.s32.totalorder %s2479_s22, 1 }
  0x12   : > { %p549_p8 = scmp.lt.s32.totalorder %s2479_s22, 3 }
  0x14   : > { %p550_p9 = pnand %p2126_p7, %p549_p8 }
  0x15   : > { %p606_p10 = scmp.lt.s32.totalorder (!%p550_p9), %s2621_s18, 1  ;;  %s2954_s2 = sld [smem:[#allocation10_spill]] (!%p550_p9)  ;;  %vm618_vm0 = vcmask (!%p550_p9), 261120   ;;  %v647_v10 = vld [vmem:[%s2926_s5] sm:$0xff] (!%p550_p9)  ;;  %v648_v11 = vld [vmem:[%s2926_s5 + $0x8] sm:$0xff] (!%p550_p9)  ;;  %v649_v12 = vld [vmem:[%s2926_s5 + $0x10] sm:$0xff] (!%p550_p9)  ;;  %v818_v34 = vlaneseq (!%p550_p9) }
  0x16   : > { %553 = sbr.rel (%p550_p9) target bundleno = 4241 (0x1091), region = 96  ;;  %s2955_s3 = sld [smem:[#allocation9_spill]] (!%p550_p9)  ;;  %v2481_v13 = vmov (!%p550_p9), 0.0|0.0   ;;  %v2314_v14 = vpack.c.bf16 (!%p550_p9), %v648_v11, %v647_v10  ;;  %v650_v15 = vld [vmem:[%s2926_s5 + $0x18] sm:$0xff] (!%p550_p9)  ;;  %vm2482_vm1 = vmmov (!%p550_p9), 0   ;;  %v2483_v16 = vmov (!%p550_p9), 0.0  }
  0x17   : > { %2313 = vmatprep.subr.bf16.mxu0 (!%p550_p9), %v2481_v13  ;;  %2215 = vmatprep.mubr.msk.f32.mxu0 (!%p550_p9), %vm2482_vm1, %v2483_v16  ;;  %v2317_v17 = vpack.c.bf16 (!%p550_p9), %v650_v15, %v649_v12  ;;  %s2956_s0 = sld [smem:[#allocation12_spill]] (!%p550_p9)  ;;  %s2957_s4 = sld [smem:[#allocation13_spill]] (!%p550_p9)  ;;  %v2130_v27 = vld [vmem:[%s2927_s6] ss:$0 sm:$0xff] (!%p550_p9)  ;;  %vm741_vm2 = vcmask (!%p550_p9), 64512   ;;  %v2716_v37 = vshrl.u32 (!%p550_p9), %v818_v34, 7 }
  0x18   : > { %2218 = vmatprep.subr.mxu1 (!%p550_p9), %v2483_v16  ;;  %2220 = vmatprep.mubr.msk.f32.mxu1 (!%p550_p9), %vm2482_vm1, %v2483_v16  ;;  %s2485_s24 = smov (!%p550_p9), 96   ;;  %s2486_s23 = smov (!%p550_p9), 88   ;;  %v735_v61 = vld [vmem:[%s2928_s7 + $0x8] sm:$0xff] (!%p550_p9)  ;;  %vm1852_vm3 = vcmask (!%p550_p9), 523264   ;;  %vm2044_vm4 = vcmask (!%p550_p9), 57344  }
  0x19   : > { %2315 = vmatpush3.bf16.msra.mxu0 (!%p550_p9), %v2314_v14  ;;  %s2958_s30 = sld [smem:[#allocation11_spill]] (!%p550_p9)  ;;  %v820_v39 = vsub.s32 (!%p550_p9), 0, %v2716_v37  ;;  %s604_s25 = sand.u32 (!%p550_p9), 1, %s2471_s21  }
  0x1a   : > { %2316 = vmatprep.subr.bf16.mxu0 (!%p550_p9), %v2481_v13 }
  0x1b   : > { %v614_v1 = vld [vmem:[%s2954_s2] sm:$0xff] (!%p550_p9) }
  0x1d   : > { %s2650_s28 = scalar_select %p606_p10, %s2621_s18, 1  ;;  %2318 = vmatpush3.bf16.msra.mxu0 %v2317_v17  ;;  %v2128_v22 = vld [vmem:[%s2956_s0] ss:$0 sm:$0xff] }
  0x1e   : > { %2228 = vmatprep.subr.mxu0 %v2483_v16  ;;  %v2129_v24 = vld [vmem:[%s2957_s4] ss:$0 sm:$0xff]  ;;  %s2159_s0 = sshll.u32 %s2621_s18, 4  ;;  %s2496_s18 = smov [#allocation3]  }
  0x1f   : > { %s2127_s29 = sshll.u32 %s2650_s28, 3  ;;  %s612_s2 = scalar_lea.vmem %s2958_s30, %s2650_s28 }
  0x20   : > { %s609_s1 = scalar_lea.vmem %s2955_s3, %s2127_s29  ;;  %s2484_s29 = smov 120   ;;  %v731_v35 = vld [vmem:[%s612_s2] sm:$0x1] }
  0x21   : > { %v613_v2 = vld [vmem:[%s609_s1] sm:$0xff]  ;;  %v732_v36 = vsub.f32 1.0, %v731_v35  ;;  %s2487_s28 = smov 56   ;;  %s2488_s1 = smov 64  }
  0x22   : > { %v615_v3 = vadd.f32 %v614_v1, %v613_v2  ;;  %s2489_s3 = smov 80   ;;  %s2491_s30 = smov 48  }
  0x23   : > { %v733_v38 = vmul.f32 -1e+09, %v732_v36  ;;  %s2492_s2 = smov 104  }
  0x24   : > { %v619_v4 = vsel %vm618_vm0, %v615_v3, 0.0 }
  0x25   : > { %620 = vadd.xlane.f32.xlu0 %v619_v4  ;;  %v2721_v40 = vrot.slane %v733_v38, %v820_v39 }
  0xb2   : > { %v621_v5 = vpop.xlane.xlu0 %620 }
  0xb3   : > { %v623_v6 = vmul.f32 0.03125, %v621_v5 }
  0xb5   : > { %v624_v7 = vsub.f32 %v615_v3, %v623_v6  ;;  %v734_v6 = vld [vmem:[%s2928_s7] sm:$0xff] }
  0xb7   : > { %v625_v8 = vmul.f32 %v624_v7, %v624_v7 }
  0xb9   : > { %v626_v9 = vsel %vm618_vm0, %v625_v8, 0.0 }
  0xba   : > { %627 = vadd.xlane.f32.xlu0 %v626_v9 }
 0x147   : > { %v628_v18 = vpop.xlane.xlu0 %627 }
 0x148   : > { %v629_v19 = vmul.f32 0.03125, %v628_v18 }
 0x14a   : > { %v630_v20 = vadd.f32 1e-05, %v629_v19 }
 0x14c   : > { %2393 = vrsqrt.f32 %v630_v20 }
 0x156   : > { %v2394_v21 = vpop.eup %2393 }
 0x157   : > { %v632_v23 = vmul.f32 %v2394_v21, %v624_v7 }
 0x159   : > { %v639_v25 = vmul.f32 %v2128_v22, %v632_v23 }
 0x15b   : > { %v2687_v26 = vadd.f32 %v2129_v24, %v639_v25 }
 0x15d   : > { %2216 = vmatmul.mubr.msk.f32.vlgmr.msra.gmra.mrb[0].mxu0 %vm618_vm0, %v2687_v26 }
 0x15e   : > { %2230 = vmatprep.mubr.msk.f32.mxu0 %vm2482_vm1, %v2483_v16 }
 0x230   : > { %v727_v28 = vpop.f32.mrb[0].mxu0 }
 0x231   : > { %v2696_v29 = vadd.f32 %v2130_v27, %v727_v28  ;;  %v2217_v30 = vpop.f32.mrb[1].mxu0 }
 0x233   : > { %911 = vrot.lane.b32.xlu0 %v2696_v29, %s2484_s29  ;;  %739 = vrot.lane.b32.xlu1 %v2696_v29, %s2485_s24  ;;  %s2490_s29 = smov 112  }
 0x237   : > { %913 = vrot.lane.b32.xlu1 %v2696_v29, %s2486_s23  ;;  %s2421_s23 = sshll.u32 %s2496_s18, 4  ;;  %s2422_s23 = int_to_ptr.vmem [resolvable:$false] %s2421_s23 }
 0x238   : > { %s2423_s4 = scalar_lea.vmem %s2422_s23, 32 }
 0x2a5   : > { %v740_v31 = vpop.permute.xlu1 %739  ;;  %v912_v33 = vpop.permute.xlu0 %911 }
 0x2a6   : > { %2219 = vmatpush3.xpose.msk.msra.mxu1 %vm741_vm2, %v740_v31 }
 0x2a7   : > { %2223 = vmatprep.subr.mxu1 %v2483_v16 }
 0x2a9   : > { %2221 = vmatmul.mubr.msk.f32.vlgmr.msra.gmra.mrb[0].mxu1 %vm741_vm2, %v2696_v29  ;;  %v914_v32 = vpop.permute.xlu1 %913 }
 0x2aa   : > { %2229 = vmatpush3.xpose.msk.msra.mxu0 %vm741_vm2, %v914_v32  ;;  %2225 = vmatprep.mubr.msk.f32.mxu1 %vm2482_vm1, %v2483_v16 }
 0x2ab   : > { %2238 = vmatprep.subr.mxu0 %v2483_v16 }
 0x2ad   : > { %2231 = vmatmul.mubr.msk.f32.vlgmr.msra.gmra.mrb[2].mxu0 %vm741_vm2, %v912_v33 }
 0x2ae   : > { %2240 = vmatprep.mubr.msk.f32.mxu0 %vm2482_vm1, %v2483_v16  ;;  %2239 = vmatpush3.msra.mxu0 %v735_v61 }
 0x2af   : > { %2248 = vmatprep.subr.mxu0 %v2483_v16 }
 0x37c   : > { %v812_v41 = vpop.f32.mrb[0].mxu1 }
 0x37d   : > { %v816_v42 = vmul.f32 0.35355338, %v812_v41  ;;  %v2222_v43 = vpop.f32.mrb[1].mxu1  ;;  %v736_v41 = vld [vmem:[%s2928_s7 + $0x10] sm:$0xff] }
 0x37f   : > { %v823_v44 = vadd.f32 %v2721_v40, %v816_v42 }
 0x380   : > { %v985_v45 = vpop.f32.mrb[2].mxu0 }
 0x381   : > { %v989_v46 = vmul.f32 0.35355338, %v985_v45  ;;  %v2232_v47 = vpop.f32.mrb[3].mxu0  ;;  %v824_v48 = vsel %vm741_vm2, %v823_v44, -inf }
 0x382   : > { %825 = vmax.xlane.f32.xlu1 %v824_v48 }
 0x383   : > { %v990_v49 = vadd.f32 %v989_v46, %v2721_v40 }
 0x385   : > { %v991_v50 = vsel %vm741_vm2, %v990_v49, -inf }
 0x386   : > { %992 = vmax.xlane.f32.xlu0 %v991_v50 }
 0x39c   : > { %1002 = vrot.lane.b32.xlu0 %v2696_v29, %s2487_s28  ;;  %s2493_s28 = smov 72  }
 0x40f   : > { %v826_v51 = vpop.xlane.xlu1 %825 }
 0x410   : > { %v827_v52 = vsub.f32 %v823_v44, %v826_v51 }
 0x412   : > { %v828_v53 = vmul.f32 1.442695, %v827_v52 }
 0x413   : > { %v993_v54 = vpop.xlane.xlu0 %992 }
 0x414   : > { %2395 = vpow2.f32 %v828_v53  ;;  %v994_v55 = vsub.f32 %v990_v49, %v993_v54  ;;  %v737_v54 = vld [vmem:[%s2928_s7 + $0x18] sm:$0xff] }
 0x416   : > { %v995_v56 = vmul.f32 1.442695, %v994_v55 }
 0x417   : > { %v1003_v3 = vpop.permute.xlu0 %1002 }
 0x418   : > { %2397 = vpow2.f32 %v995_v56 }
 0x41e   : > { %v2396_v57 = vpop.eup %2395 }
 0x41f   : > { %v830_v58 = vsel %vm741_vm2, %v2396_v57, 0.0 }
 0x420   : > { %831 = vadd.xlane.f32.xlu1 %v830_v58 }
 0x422   : > { %v2398_v59 = vpop.eup %2397 }
 0x423   : > { %v997_v60 = vsel %vm741_vm2, %v2398_v59, 0.0 }
 0x424   : > { %998 = vadd.xlane.f32.xlu1 %v997_v60 }
 0x435   : > { %835 = vrot.lane.b32.xlu1 %v2696_v29, %s2488_s1 }
 0x439   : > { %1226 = vrot.lane.b32.xlu1 %v2696_v29, %s2489_s3  ;;  %s2879_s3 = scalar_lea.hbm %s2940_s19, %s2159_s0 }
 0x43d   : > { %1224 = vrot.lane.b32.xlu1 %v2696_v29, %s2490_s29  ;;  %s2494_s29 = smov 40  }
 0x4ad   : > { %v832_v62 = vpop.xlane.xlu1 %831 }
 0x4ae   : > { %2399 = vrcp.f32 %v832_v62 }
 0x4b1   : > { %v999_v63 = vpop.xlane.xlu1 %998 }
 0x4b2   : > { %2401 = vrcp.f32 %v999_v63  ;;  %v2148_v63 = vld [vmem:[%s2929_s8] ss:$0 sm:$0xff] }
 0x4b5   : > { %v836_v0 = vpop.permute.xlu1 %835 }
 0x4b6   : > { %2224 = vmatpush3.msra.mxu1 %v836_v0 }
 0x4b7   : > { %2233 = vmatprep.subr.mxu1 %v2483_v16 }
 0x4b8   : > { %v2400_v1 = vpop.eup %2399 }
 0x4b9   : > { %v834_v2 = vmul.f32 %v2400_v1, %v2396_v57  ;;  %v1227_v9 = vpop.permute.xlu1 %1226 }
 0x4bb   : > { %2226 = vmatmul.mubr.msk.f32.vlgmr.msra.gmra.mrb[2].mxu1 %vm741_vm2, %v834_v2 }
 0x4bc   : > { %v2402_v4 = vpop.eup %2401  ;;  %2234 = vmatpush3.msra.mxu1 %v1003_v3  ;;  %2235 = vmatprep.mubr.msk.f32.mxu1 %vm2482_vm1, %v2483_v16 }
 0x4bd   : > { %v1001_v5 = vmul.f32 %v2402_v4, %v2398_v59  ;;  %2243 = vmatprep.subr.mxu1 %v2483_v16  ;;  %v1225_v12 = vpop.permute.xlu1 %1224 }
 0x4bf   : > { %2236 = vmatmul.mubr.msk.f32.vlgmr.msra.gmra.mrb[4].mxu1 %vm741_vm2, %v1001_v5 }
 0x4c0   : > { %2245 = vmatprep.mubr.msk.f32.mxu1 %vm2482_vm1, %v2483_v16  ;;  %2244 = vmatpush3.msra.mxu1 %v734_v6 }
 0x4c1   : > { %2253 = vmatprep.subr.mxu1 %v2483_v16 }
 0x58e   : > { %v907_v7 = vpop.f32.mrb[2].mxu1 }
 0x58f   : > { %v2227_v8 = vpop.f32.mrb[3].mxu1  ;;  %2246 = vmatmul.mubr.msk.f32.vlgmr.msra.gmra.mrb[6].mxu1 %vm741_vm2, %v907_v7 }
 0x590   : > { %2255 = vmatprep.mubr.msk.f32.mxu1 %vm2482_vm1, %v2483_v16 }
 0x592   : > { %v1074_v10 = vpop.f32.mrb[4].mxu1 }
 0x593   : > { %v2237_v11 = vpop.f32.mrb[5].mxu1  ;;  %2241 = vmatmul.mubr.msk.f32.vlgmr.msra.gmra.mrb[4].mxu0 %vm741_vm2, %v1074_v10  ;;  %v1744_v10 = vld [vmem:[%s2932_s11] sm:$0xff] }
 0x594   : > { %2249 = vmatpush3.xpose.msk.msra.mxu0 %vm741_vm2, %v1227_v9  ;;  %2250 = vmatprep.mubr.msk.f32.mxu0 %vm2482_vm1, %v2483_v16  ;;  %v1745_v11 = vld [vmem:[%s2932_s11 + $0x8] sm:$0xff] }
 0x595   : > { %2258 = vmatprep.subr.mxu0 %v2483_v16 }
 0x597   : > { %2251 = vmatmul.mubr.msk.f32.vlgmr.msra.gmra.mrb[6].mxu0 %vm741_vm2, %v1225_v12  ;;  %v2320_v12 = vpack.c.bf16 %v1745_v11, %v1744_v10  ;;  %v1956_v10 = vld [vmem:[%s2938_s17] sm:$0x1] }
 0x598   : > { %2260 = vmatprep.mubr.msk.f32.mxu0 %vm2482_vm1, %v2483_v16  ;;  %2259 = vmatpush3.msra.mxu0 %v736_v41 }
 0x599   : > { %2268 = vmatprep.subr.mxu0 %v2483_v16 }
 0x662   : > { %v1220_v14 = vpop.f32.mrb[6].mxu1 }
 0x663   : > { %v2247_v15 = vpop.f32.mrb[7].mxu1 }
 0x666   : > { %v1147_v17 = vpop.f32.mrb[4].mxu0 }
 0x667   : > { %v1221_v18 = vadd.f32 %v1220_v14, %v1147_v17  ;;  %v2242_v19 = vpop.f32.mrb[5].mxu0  ;;  %v1747_v14 = vld [vmem:[%s2932_s11 + $0x18] sm:$0xff] }
 0x66a   : > { %v1298_v20 = vpop.f32.mrb[6].mxu0 }
 0x66b   : > { %v1302_v21 = vmul.f32 0.35355338, %v1298_v20  ;;  %v2252_v22 = vpop.f32.mrb[7].mxu0 }
 0x66d   : > { %v1303_v23 = vadd.f32 %v1302_v21, %v2721_v40  ;;  %v2149_v21 = vld [vmem:[%s2930_s9] ss:$0 sm:$0xff] }
 0x66f   : > { %v1304_v24 = vsel %vm741_vm2, %v1303_v23, -inf }
 0x670   : > { %1305 = vmax.xlane.f32.xlu1 %v1304_v24 }
 0x681   : > { %1315 = vrot.lane.b32.xlu1 %v2696_v29, %s2491_s30  ;;  %s605_s30 = scalar_lea.vmem [#allocation3], %s604_s25 }
 0x685   : > { %1465 = vrot.lane.b32.xlu1 %v2696_v29, %s2492_s2  ;;  %s2059_s2 = sshll.u32 %s605_s30, 4  ;;  %s2881_s2 = int_to_ptr.vmem [resolvable:$true] %s2059_s2 }
 0x686   : > { %s2417_s24 = scalar_lea.vmem %s2881_s2, 16  ;;  %p2424_p0 = scmp.lt.s32.totalorder %s2881_s2, %s2422_s23 }
 0x687   : > { %p2418_p11 = scmp.ne.s32.totalorder %s2881_s2, %s2417_s24  ;;  %p2425_p1 = scmp.lt.s32.totalorder %s2423_s4, %s2417_s24 }
 0x689   : > { %p2419_p12 = pnand %p2418_p11, %p2638_p5  ;;  %p2426_p2 = por %p2425_p1, %p2424_p0 }
 0x68b   : > { %p2420_p13 = pneg %p2419_p12 }
 0x68d   : > { %p2427_p3 = pnand %p2426_p2, %p2420_p13 }
 0x6fd   : > { %v1306_v25 = vpop.xlane.xlu1 %1305 }
 0x6fe   : > { %v1307_v27 = vsub.f32 %v1303_v23, %v1306_v25  ;;  %v2150_v23 = vld [vmem:[%s2931_s10] ss:$0 sm:$0xff] }
 0x700   : > { %v1308_v28 = vmul.f32 1.442695, %v1307_v27  ;;  %v1837_v27 = vld [vmem:[%s2934_s13] sm:$0xff] }
 0x701   : > { %v1316_v30 = vpop.permute.xlu1 %1315 }
 0x702   : > { %2403 = vpow2.f32 %v1308_v28  ;;  %2254 = vmatpush3.msra.mxu1 %v1316_v30  ;;  %v1838_v28 = vld [vmem:[%s2934_s13 + $0x8] sm:$0xff] }
 0x703   : > { %2263 = vmatprep.subr.mxu1 %v2483_v16  ;;  %v2326_v30 = vpack.c.bf16 %v1838_v28, %v1837_v27 }
 0x705   : > { %v1466_v38 = vpop.permute.xlu1 %1465 }
 0x70c   : > { %v2404_v31 = vpop.eup %2403 }
 0x70d   : > { %v1310_v32 = vsel %vm741_vm2, %v2404_v31, 0.0 }
 0x70e   : > { %1311 = vadd.xlane.f32.xlu0 %v1310_v32 }
 0x724   : > { %1467 = vrot.lane.b32.xlu0 %v2696_v29, %s2493_s28 }
 0x79b   : > { %v1312_v33 = vpop.xlane.xlu0 %1311 }
 0x79c   : > { %2405 = vrcp.f32 %v1312_v33  ;;  %v1841_v33 = vld [vmem:[%s2934_s13 + $0x20] sm:$0xff] }
 0x79f   : > { %v1468_v36 = vpop.permute.xlu0 %1467 }
 0x7a6   : > { %v2406_v34 = vpop.eup %2405 }
 0x7a7   : > { %v1314_v35 = vmul.f32 %v2406_v34, %v2404_v31  ;;  %v1839_v31 = vld [vmem:[%s2934_s13 + $0x10] sm:$0xff]  ;;  %v1842_v34 = vld [vmem:[%s2934_s13 + $0x28] sm:$0xff] }
 0x7a9   : > { %2256 = vmatmul.mubr.msk.f32.vlgmr.msra.gmra.mrb[8].mxu1 %vm741_vm2, %v1314_v35  ;;  %v2332_v35 = vpack.c.bf16 %v1842_v34, %v1841_v33 }
 0x7aa   : > { %2264 = vmatpush3.xpose.msk.msra.mxu1 %vm741_vm2, %v1468_v36  ;;  %2265 = vmatprep.mubr.msk.f32.mxu1 %vm2482_vm1, %v2483_v16  ;;  %v1843_v36 = vld [vmem:[%s2934_s13 + $0x30] sm:$0xff] }
 0x7ab   : > { %2273 = vmatprep.subr.mxu1 %v2483_v16 }
 0x7ad   : > { %2266 = vmatmul.mubr.msk.f32.vlgmr.msra.gmra.mrb[10].mxu1 %vm741_vm2, %v1466_v38  ;;  %v1844_v38 = vld [vmem:[%s2934_s13 + $0x38] sm:$0xff] }
 0x7ae   : > { %2275 = vmatprep.mubr.msk.f32.mxu1 %vm2482_vm1, %v2483_v16  ;;  %2274 = vmatpush3.msra.mxu1 %v737_v54  ;;  %v2335_v41 = vpack.c.bf16 %v1844_v38, %v1843_v36  ;;  %v2153_v54 = vld [vmem:[%s2935_s14] ss:$0 sm:$0xff] }
 0x7af   : > { %2325 = vmatprep.subr.bf16.mxu1 %v2481_v13 }
 0x87c   : > { %v1387_v42 = vpop.f32.mrb[8].mxu1 }
 0x87d   : > { %v2257_v43 = vpop.f32.mrb[9].mxu1  ;;  %2261 = vmatmul.mubr.msk.f32.vlgmr.msra.gmra.mrb[8].mxu0 %vm741_vm2, %v1387_v42  ;;  %v2151_v42 = vld [vmem:[%s2933_s12] ss:$0 sm:$0xff] }
 0x87e   : > { %2270 = vmatprep.mubr.msk.f32.mxu0 %vm2482_vm1, %v2483_v16 }
 0x880   : > { %v1539_v44 = vpop.f32.mrb[10].mxu1 }
 0x881   : > { %v1543_v45 = vmul.f32 0.35355338, %v1539_v44  ;;  %v2267_v46 = vpop.f32.mrb[11].mxu1 }
 0x883   : > { %v1544_v47 = vadd.f32 %v1543_v45, %v2721_v40 }
 0x885   : > { %v1545_v48 = vsel %vm741_vm2, %v1544_v47, -inf }
 0x886   : > { %1546 = vmax.xlane.f32.xlu1 %v1545_v48 }
 0x913   : > { %v1547_v49 = vpop.xlane.xlu1 %1546 }
 0x914   : > { %v1548_v50 = vsub.f32 %v1544_v47, %v1547_v49 }
 0x916   : > { %v1549_v51 = vmul.f32 1.442695, %v1548_v50 }
 0x918   : > { %2407 = vpow2.f32 %v1549_v51 }
 0x922   : > { %v2408_v52 = vpop.eup %2407 }
 0x923   : > { %v1551_v53 = vsel %vm741_vm2, %v2408_v52, 0.0 }
 0x924   : > { %1552 = vadd.xlane.f32.xlu0 %v1551_v53 }
 0x93a   : > { %1556 = vrot.lane.b32.xlu0 %v2696_v29, %s2494_s29  ;;  %s2047_s29 = scalar_lea.sflag [#allocation4], %s604_s25 }
 0x950   : > { %v1460_v40 = vpop.f32.mrb[8].mxu0 }
 0x951   : > { %v1464_v55 = vadd.f32 %v1460_v40, %v1221_v18  ;;  %v2262_v56 = vpop.f32.mrb[9].mxu0 }
 0x9b1   : > { %v1553_v57 = vpop.xlane.xlu0 %1552 }
 0x9b2   : > { %2409 = vrcp.f32 %v1553_v57 }
 0x9b5   : > { %v1557_v58 = vpop.permute.xlu0 %1556 }
 0x9b6   : > { %2269 = vmatpush3.msra.mxu0 %v1557_v58 }
 0x9b7   : > { %2319 = vmatprep.subr.bf16.mxu0 %v2481_v13 }
 0x9bc   : > { %v2410_v59 = vpop.eup %2409 }
 0x9bd   : > { %v1555_v60 = vmul.f32 %v2410_v59, %v2408_v52 }
 0x9bf   : > { %2271 = vmatmul.mubr.msk.f32.vlgmr.msra.gmra.mrb[10].mxu0 %vm741_vm2, %v1555_v60 }
 0x9c0   : > { %2286 = vmatprep.mubr.msk.f32.mxu0 %vm2482_vm1, %v2483_v16  ;;  %2321 = vmatpush3.bf16.msra.mxu0 %v2320_v12 }
 0x9c1   : > { %2322 = vmatprep.subr.bf16.mxu0 %v2481_v13 }
 0xa92   : > { %v1628_v29 = vpop.f32.mrb[10].mxu0 }
 0xa93   : > { %v2272_v61 = vpop.f32.mrb[11].mxu0  ;;  %2276 = vmatmul.mubr.msk.f32.vlgmr.msra.gmra.mrb[12].mxu1 %vm741_vm2, %v1628_v29 }
 0xa94   : > { %2305 = vmatprep.mubr.msk.f32.mxu1 %vm2482_vm1, %v2483_v16  ;;  %2327 = vmatpush3.bf16.msra.mxu1 %v2326_v30 }
 0xa95   : > { %2328 = vmatprep.subr.bf16.mxu1 %v2481_v13 }
 0xb66   : > { %v1701_v62 = vpop.f32.mrb[12].mxu1 }
 0xb67   : > { %v1705_v0 = vadd.f32 %v1701_v62, %v1464_v55  ;;  %v2277_v1 = vpop.f32.mrb[13].mxu1 }
 0xb69   : > { %v1713_v2 = vadd.f32 %v2148_v63, %v1705_v0  ;;  %v1957_v63 = vld [vmem:[#allocation2] sm:$0x1]  ;;  %v2495_v0 = vmov 0  }
 0xb6a   : > { %2391 = vset.pattern.permute.xlu1 %v2495_v0  ;;  %2392 = vset.pattern.permute.xlu0 %v2495_v0 }
 0xb6b   : > { %v1714_v3 = vadd.f32 %v1713_v2, %v2687_v26  ;;  %v1746_v26 = vld [vmem:[%s2932_s11 + $0x10] sm:$0xff] }
 0xb6c   : > { %v2323_v15 = vpack.c.bf16 %v1747_v14, %v1746_v26 }
 0xb6d   : > { %v1717_v4 = vsel %vm618_vm0, %v1714_v3, 0.0 }
 0xb6e   : > { %1718 = vadd.xlane.f32.xlu1 %v1717_v4  ;;  %2324 = vmatpush3.bf16.msra.mxu0 %v2323_v15 }
 0xb6f   : > { %2308 = vmatprep.subr.mxu0 %v2483_v16 }
 0xbfb   : > { %v1719_v5 = vpop.xlane.xlu1 %1718 }
 0xbfc   : > { %v1720_v6 = vmul.f32 0.03125, %v1719_v5  ;;  %v2155_v5 = vld [vmem:[%s2936_s15] ss:$0 sm:$0xff] }
 0xbfe   : > { %v1721_v7 = vsub.f32 %v1714_v3, %v1720_v6 }
 0xc00   : > { %v1722_v8 = vmul.f32 %v1721_v7, %v1721_v7 }
 0xc02   : > { %v1723_v9 = vsel %vm618_vm0, %v1722_v8, 0.0 }
 0xc03   : > { %1724 = vadd.xlane.f32.xlu1 %v1723_v9 }
 0xc90   : > { %v1725_v17 = vpop.xlane.xlu1 %1724 }
 0xc91   : > { %v1726_v18 = vmul.f32 0.03125, %v1725_v17 }
 0xc93   : > { %v1727_v19 = vadd.f32 1e-05, %v1726_v18 }
 0xc95   : > { %2411 = vrsqrt.f32 %v1727_v19 }
 0xc9f   : > { %v2412_v20 = vpop.eup %2411 }
 0xca0   : > { %v1729_v22 = vmul.f32 %v2412_v20, %v1721_v7  ;;  %v2156_v7 = vld [vmem:[%s2937_s16] ss:$0 sm:$0xff] }
 0xca2   : > { %v1736_v24 = vmul.f32 %v2149_v21, %v1729_v22 }
 0xca4   : > { %v1743_v25 = vadd.f32 %v2150_v23, %v1736_v24 }
 0xca6   : > { %2287 = vmatmul.mubr.msk.f32.vlgmr.msra.gmra.mrb[12].mxu0 %vm618_vm0, %v1743_v25 }
 0xca7   : > { %2310 = vmatprep.mubr.msk.f32.mxu0 %vm2482_vm1, %v2483_v16  ;;  %v1840_v16 = vld [vmem:[%s2934_s13 + $0x18] sm:$0xff] }
 0xca8   : > { %v2329_v32 = vpack.c.bf16 %v1840_v16, %v1839_v31 }
 0xcaa   : > { %2330 = vmatpush3.bf16.msra.mxu1 %v2329_v32 }
 0xcab   : > { %2331 = vmatprep.subr.bf16.mxu1 %v2481_v13 }
 0xcae   : > { %2333 = vmatpush3.bf16.msra.mxu1 %v2332_v35 }
 0xcaf   : > { %2334 = vmatprep.subr.bf16.mxu1 %v2481_v13 }
 0xcb2   : > { %2336 = vmatpush3.bf16.msra.mxu1 %v2335_v41 }
 0xd79   : > { %v1824_v43 = vpop.f32.mrb[12].mxu0 }
 0xd7a   : > { %v1825_v44 = vadd.f32 %v2151_v42, %v1824_v43  ;;  %v2288_v45 = vpop.f32.mrb[13].mxu0 }
 0xd7c   : > { %v1828_v46 = vmul.f32 %v1825_v44, %v1825_v44 }
 0xd7e   : > { %v1829_v47 = vmul.f32 %v1828_v46, %v1825_v44 }
 0xd80   : > { %v1830_v13 = vmul.f32 0.044715, %v1829_v47 }
 0xd82   : > { %v1831_v48 = vadd.f32 %v1830_v13, %v1825_v44 }
 0xd84   : > { %v1832_v49 = vmul.f32 0.7978846, %v1831_v48 }
 0xd86   : > { %2413 = vtanh.f32 %v1832_v49 }
 0xd90   : > { %v2414_v50 = vpop.eup %2413 }
 0xd91   : > { %v1834_v51 = vadd.f32 1.0, %v2414_v50 }
 0xd93   : > { %v1835_v52 = vmul.f32 0.5, %v1834_v51 }
 0xd95   : > { %v1836_v53 = vmul.f32 %v1835_v52, %v1825_v44 }
 0xd97   : > { %2306 = vmatmul.mubr.msk.f32.vlgmr.msra.gmra.mrb[14].mxu1 %vm1852_vm3, %v1836_v53 }
 0xe6a   : > { %v1922_v40 = vpop.f32.mrb[14].mxu1 }
 0xe6b   : > { %v1923_v55 = vadd.f32 %v2153_v54, %v1922_v40  ;;  %v2307_v56 = vpop.f32.mrb[15].mxu1 }
 0xe6d   : > { %v1926_v57 = vadd.f32 %v1923_v55, %v1743_v25 }
 0xe6f   : > { %v1929_v58 = vsel %vm618_vm0, %v1926_v57, 0.0 }
 0xe70   : > { %1930 = vadd.xlane.f32.xlu1 %v1929_v58 }
 0xefd   : > { %v1931_v59 = vpop.xlane.xlu1 %1930 }
 0xefe   : > { %v1932_v60 = vmul.f32 0.03125, %v1931_v59 }
 0xf00   : > { %v1933_v29 = vsub.f32 %v1926_v57, %v1932_v60 }
 0xf02   : > { %v1934_v61 = vmul.f32 %v1933_v29, %v1933_v29 }
 0xf04   : > { %v1935_v62 = vsel %vm618_vm0, %v1934_v61, 0.0 }
 0xf05   : > { %1936 = vadd.xlane.f32.xlu1 %v1935_v62 }
 0xf16   : > { %1960 = vperm.xlu1 %2391, %v1957_v63  }
 0xf92   : > { %v1937_v1 = vpop.xlane.xlu1 %1936 }
 0xf93   : > { %v1938_v2 = vmul.f32 0.03125, %v1937_v1 }
 0xf95   : > { %v1939_v3 = vadd.f32 1e-05, %v1938_v2 }
 0xf96   : > { %v1961_v11 = vpop.permute.xlu1 %1960 }
 0xf97   : > { %2415 = vrsqrt.f32 %v1939_v3  ;;  %v1966_v12 = vrot.slane %v1961_v11, %v820_v39 }
 0xfa1   : > { %v2416_v4 = vpop.eup %2415 }
 0xfa2   : > { %v1941_v6 = vmul.f32 %v2416_v4, %v1933_v29 }
 0xfa4   : > { %v1948_v8 = vmul.f32 %v2155_v5, %v1941_v6 }
 0xfa6   : > { %v1955_v9 = vadd.f32 %v2156_v7, %v1948_v8 }
 0xfa8   : > { %2309 = vmatpush3.xpose.msk.msra.mxu0 %vm618_vm0, %v1955_v9 }
 0xfab   : > { %2311 = vmatmul.mubr.msk.f32.vlgmr.msra.gmra.mrb[14].mxu0 %vm618_vm0, %v1956_v10 }
0x107e   : > { %v2039_v26 = vpop.f32.mrb[14].mxu0 }
0x107f   : > { %v2040_v14 = vadd.f32 %v2039_v26, %v1966_v12  ;;  %v2312_v15 = vpop.f32.mrb[15].mxu0 }
0x1081   : > { %v2043_v17 = vmax.f32 %v2040_v14, 0.0 }
0x1083   : > { %2045 = vst.msk [vmem:[%s605_s30] sm:$0x1] %vm2044_vm4, %v2043_v17 }
0x1084   : > { %2430 = shalt.err (!%p2427_p3)
}
0x1085   : > { %s2431_s25 = scalar_lea.hbm %s2879_s3, 16  ;;  %s2435_s28 = scalar_lea.hbm %s2940_s19, 32 }
0x1086   : > { %p2432_p4 = scmp.ne.s32.totalorder %s2879_s3, %s2431_s25  ;;  %p2436_p9 = scmp.lt.u32.totalorder %s2879_s3, %s2940_s19 }
0x1087   : > { %p2437_p10 = scmp.lt.u32.totalorder %s2435_s28, %s2431_s25  ;;  %p2439_p12 = scmp.lt.u32.totalorder %s2431_s25, %s2879_s3 }
0x1088   : > { %p2433_p7 = pnand %p2432_p4, %p2638_p5 }
0x1089   : > { %p2438_p11 = por %p2437_p10, %p2436_p9 }
0x108a   : > { %p2434_p8 = pneg %p2433_p7 }
0x108b   : > { %p2440_p13 = por %p2439_p12, %p2438_p11 }
0x108d   : > { %p2441_p0 = pnand %p2440_p13, %p2434_p8 }
0x108f   : > { %2444 = shalt.err (!%p2441_p0)
}
0x1090   : > { %2337 = dma.vmem_to_hbm [thread:$0]  (%p2638_p5), %s2881_s2, 16, %s2879_s3, %s2047_s29  }
0x1091 PF: > { %p2343_p1 = scmp.ge.s32.totalorder %s2479_s22, 2  ;;  %s2071_s4 = sand.u32 1, %s2467_s20  }
0x1092   : > { %s2072_s24 = scalar_lea.sflag [#allocation4], %s2071_s4 }
0x1093   : > { %p2340_p2 = pnand %p2343_p1, %p2642_p6 }
0x1095   : > { %2462 = dma.done.wait (!%p2340_p2), %s2072_s24, 16  }
0x1096   : > { %2464 = vsyncadd (!%p2340_p2), %s2072_s24, 4294967280  ;;  %s2959_s22 = sld [smem:[#allocation7_spill]]  ;;  %s2960_s23 = sld [smem:[#allocation6_spill]] }
0x1097   : > { %s2961_s1 = sld [smem:[#allocation8_spill]]  ;;  %s2962_s20 = smov %s2471_s21 }
0x109c   : > { %p31_p3 = scmp.ge.s32.totalorder %s2959_s22, 4   ;;  %s2963_s21 = smov %s2960_s23 }
0x109e   :  { %33 = sbr.rel (!%p31_p3) target bundleno = 9 (0x9), region = 134 }
0x10a5   :  { %2076 = vsyncpa [#allocation4], 1 }
0x10a6   :  { %2078 = vsyncpa [#allocation4 + $0x1], 1 }

</bundles_post_ra>
